<compile_context>
chip_gen: v6e
topology: v6e:2x2x1
jax: 0.10.0
libtpu: 0.0.40
codegen_flags: <defaults>
</compile_context>

<pallas_src>
import functools

import jax
import jax.numpy as jnp
from jax import lax
from jax.experimental import pallas as pl
from jax.experimental.pallas import tpu as pltpu


# ------------------------- device / tiling configuration ----------------------

def _device_kind():
    try:
        return jax.devices()[0].device_kind.lower()
    except Exception:
        return ""


def _gen_config():
    """Returns (k-tiled tb, k-tiled tk, vmem_limit_bytes) per TPU generation."""
    kind = _device_kind()
    if "v5" in kind:   # 128 MiB physical VMEM, tiny default scoped window
        return 512, 512, 80 << 20
    if "v6" in kind:   # 128 MiB physical VMEM
        return 1024, 1024, 96 << 20
    if "v7" in kind:   # only 64 MiB VMEM per TensorCore
        return 512, 1024, 48 << 20
    return 512, 512, 48 << 20


def _largest_dividing_tile(D, target, align=128):
    t = (min(target, D) // align) * align
    while t >= align:
        if D % t == 0:
            return t
        t -= align
    return None


# ------------------------------ tiny / small path -----------------------------

def _qtq_small_kernel(q_ref, o_ref):
    q = q_ref[...]
    # Q^T @ Q == contract over axis 0 of both operands (MXU transposed-LHS).
    o_ref[...] = lax.dot_general(
        q, q,
        dimension_numbers=(((0,), (0,)), ((), ())),
        preferred_element_type=jnp.float32,
    )


def _qtq_small(Q, vmem_limit):
    D = Q.shape[0]
    return pl.pallas_call(
        _qtq_small_kernel,
        out_shape=jax.ShapeDtypeStruct((D, D), jnp.float32),
        in_specs=[pl.BlockSpec(memory_space=pltpu.MemorySpace.VMEM)],
        out_specs=pl.BlockSpec(memory_space=pltpu.MemorySpace.VMEM),
        compiler_params=pltpu.CompilerParams(vmem_limit_bytes=vmem_limit),
    )(Q)


# ------------------------------- batched tiny path -----------------------------

def _qtq_batched_kernel(q_ref, o_ref):
    q = q_ref[...]  # (bb, D, D)
    # Per-batch Q^T @ Q: contract over axis 1 (rows), batch over axis 0.
    o_ref[...] = lax.dot_general(
        q, q,
        dimension_numbers=(((1,), (1,)), ((0,), (0,))),
        preferred_element_type=jnp.float32,
    )


def euclidean_nn_forward_batched(Qs, z=None):
    """Batched forward: Qs is (B, D, D); returns (B, D, D) of Q^T Q per batch.

    Recommended entry point for the production hidden=32 case — batching many
    tiny Q matrices into one pallas_call amortizes the fixed launch/DMA cost.
    `z` is accepted for API parity with the PyTorch module and ignored.
    """
    B, D, D2 = Qs.shape
    assert D == D2
    Qs = Qs.astype(jnp.float32)
    _, _, vmem_limit = _gen_config()

    # Pack as many batch elements per grid step as fit ~2 MiB per input buffer,
    # so each step does meaningful MXU work instead of pure per-step overhead.
    bb = max(1, min(B, (2 << 20) // max(1, D * D * 4)))
    while B % bb:
        bb -= 1

    return pl.pallas_call(
        _qtq_batched_kernel,
        out_shape=jax.ShapeDtypeStruct((B, D, D), jnp.float32),
        grid_spec=pltpu.PrefetchScalarGridSpec(
            num_scalar_prefetch=0,
            grid=(B // bb,),
            in_specs=[pl.BlockSpec((bb, D, D), lambda b: (b, 0, 0))],
            out_specs=pl.BlockSpec((bb, D, D), lambda b: (b, 0, 0)),
        ),
        compiler_params=pltpu.CompilerParams(
            dimension_semantics=("parallel",),
            vmem_limit_bytes=vmem_limit,
        ),
    )(Qs)


# --------------------------- VMEM-resident tiled path --------------------------

def _qtq_resident_kernel(q_ref, o_ref, *, tb):
    i = pl.program_id(0)
    # (D, tb) column panel of Q, 128-aligned dynamic lane slice.
    qi = q_ref[:, pl.ds(pl.multiple_of(i * tb, 128), tb)]
    # (Q^T Q)[i-panel, :] = qi^T @ Q — contraction over axis 0 of both operands
    # (hardware transposed-LHS matmul, no XLU transpose).  Direct store: no
    # accumulator, no k axis, lane-dense (tb, D) output block.
    o_ref[...] = lax.dot_general(
        qi, q_ref[...],
        dimension_numbers=(((0,), (0,)), ((), ())),
        preferred_element_type=jnp.float32,
    )


def _qtq_resident(Q, vmem_limit, tb=None):
    D = Q.shape[0]
    if D % 128:
        return None
    tb = tb if tb is not None else _largest_dividing_tile(D, 256)
    if tb is None or D % tb:
        return None
    # Budget conservatively: Q may be double-buffered even though its block
    # index never changes, plus double-buffered (tb, D) output panels.
    need = 2 * D * D * 4 + 2 * tb * D * 4
    if need > int(vmem_limit * 0.9):
        return None
    nb = D // tb
    return pl.pallas_call(
        functools.partial(_qtq_resident_kernel, tb=tb),
        out_shape=jax.ShapeDtypeStruct((D, D), jnp.float32),
        grid_spec=pltpu.PrefetchScalarGridSpec(
            num_scalar_prefetch=0,
            grid=(nb,),
            in_specs=[pl.BlockSpec((D, D), lambda i: (0, 0))],   # resident Q
            out_specs=pl.BlockSpec((tb, D), lambda i: (i, 0)),
        ),
        compiler_params=pltpu.CompilerParams(
            dimension_semantics=("parallel",),   # megacore splits row panels
            vmem_limit_bytes=vmem_limit,
        ),
    )(Q)


# ------------------------ k-accumulating tiled fallback ------------------------

def _qtq_ktiled_kernel(qi_ref, qj_ref, o_ref, acc_ref):
    k = pl.program_id(2)

    @pl.when(k == 0)
    def _():
        acc_ref[...] = jnp.zeros_like(acc_ref)

    # qi_ref: (tk, tb) block Q[k, i]; qj_ref: (tk, tb) block Q[k, j].
    acc_ref[...] += lax.dot_general(
        qi_ref[...], qj_ref[...],
        dimension_numbers=(((0,), (0,)), ((), ())),
        preferred_element_type=jnp.float32,
    )

    @pl.when(k == pl.num_programs(2) - 1)
    def _():
        o_ref[...] = acc_ref[...]


def _qtq_ktiled_nk1_kernel(qi_ref, qj_ref, o_ref):
    # Single contraction step: write straight to the output, no accumulator.
    o_ref[...] = lax.dot_general(
        qi_ref[...], qj_ref[...],
        dimension_numbers=(((0,), (0,)), ((), ())),
        preferred_element_type=jnp.float32,
    )


def _qtq_ktiled(Q, tb_target, tk_target, vmem_limit):
    D = Q.shape[0]
    tb = _largest_dividing_tile(D, tb_target)
    tk = _largest_dividing_tile(D, tk_target)
    if tb is None or tk is None:
        return None
    nb, nk = D // tb, D // tk

    if nk == 1:
        kernel = _qtq_ktiled_nk1_kernel
        scratch = []
    else:
        kernel = _qtq_ktiled_kernel
        scratch = [pltpu.VMEM((tb, tb), jnp.float32)]

    return pl.pallas_call(
        kernel,
        out_shape=jax.ShapeDtypeStruct((D, D), jnp.float32),
        grid_spec=pltpu.PrefetchScalarGridSpec(
            num_scalar_prefetch=0,
            grid=(nb, nb, nk),                       # reduction axis last
            in_specs=[
                pl.BlockSpec((tk, tb), lambda i, j, k: (k, i)),
                pl.BlockSpec((tk, tb), lambda i, j, k: (k, j)),
            ],
            out_specs=pl.BlockSpec((tb, tb), lambda i, j, k: (i, j)),
            scratch_shapes=scratch,
        ),
        compiler_params=pltpu.CompilerParams(
            dimension_semantics=("parallel", "parallel", "arbitrary"),
            vmem_limit_bytes=vmem_limit,
        ),
    )(Q, Q)


# --------------------------------- public wrapper ------------------------------

def euclidean_nn_forward(Q, z=None, *, block=None, block_k=None, force_path=None):
    """Pallas implementation of euclidean_nn.forward: returns Q.T @ Q.

    `z` is accepted for API parity with the PyTorch module but is unused,
    exactly like the reference forward pass.  `force_path` in
    {None, "small", "resident", "ktiled"} is for testing.
    """
    D = Q.shape[0]
    assert Q.shape == (D, D)
    Q = Q.astype(jnp.float32)
    tb_k, tk_k, vmem_limit = _gen_config()

    if force_path == "small":
        return _qtq_small(Q, vmem_limit)
    if force_path == "resident":
        out = _qtq_resident(Q, vmem_limit, tb=block)
        assert out is not None, "resident path not applicable for this shape"
        return out
    if force_path == "ktiled":
        out = _qtq_ktiled(Q, block or tb_k, block_k or tk_k, vmem_limit)
        assert out is not None, "k-tiled path not applicable for this shape"
        return out

    # TODO(synk): very large D that is not a multiple of 128 would need a
    # zero-pad-to-128 + slice wrapper; not needed for the production shapes.
    if D % 128 != 0 or D <= 1024:
        return _qtq_small(Q, vmem_limit)

    out = _qtq_resident(Q, vmem_limit, tb=block)
    if out is not None:
        return out
    out = _qtq_ktiled(Q, block or tb_k, block_k or tk_k, vmem_limit)
    if out is not None:
        return out
    return _qtq_small(Q, vmem_limit)


if __name__ == "__main__":
    key = jax.random.PRNGKey(0)
    kq, kb, kq2, kz = jax.random.split(key, 4)

    # 1) Production-like tiny shape (hidden=32): single Q, full-block path.
    D_small = 32
    Q_small = jax.random.uniform(kq, (D_small, D_small), dtype=jnp.float32)
    z = jax.random.uniform(kz, (2, D_small), dtype=jnp.float32)  # ignored, as in the reference
    out_small = jax.block_until_ready(euclidean_nn_forward(Q_small, z))
    ref_small = Q_small.T @ Q_small
    assert out_small.shape == (D_small, D_small)
    assert jnp.allclose(out_small, ref_small, atol=1e-5, rtol=1e-5)

    # 2) Batched tiny case: amortize launch/DMA overhead across B modules.
    B = 8
    Q_batch = jax.random.uniform(kb, (B, D_small, D_small), dtype=jnp.float32)
    out_batch = jax.block_until_ready(euclidean_nn_forward_batched(Q_batch))
    ref_batch = jnp.einsum("bkm,bkn->bmn", Q_batch, Q_batch)
    assert out_batch.shape == (B, D_small, D_small)
    assert jnp.allclose(out_batch, ref_batch, atol=1e-4, rtol=1e-4)

    # 3) VMEM-resident tiled path (block=128 forces a 2-step output grid).
    D_big = 256
    Q_big = jax.random.uniform(kq2, (D_big, D_big), dtype=jnp.float32)
    ref_big = jnp.matmul(Q_big.T, Q_big, precision=lax.Precision.HIGHEST)
    out_res = jax.block_until_ready(
        euclidean_nn_forward(Q_big, None, block=128, force_path="resident"))
    assert out_res.shape == (D_big, D_big)
    assert jnp.allclose(out_res, ref_big, atol=2e-3, rtol=2e-3)

    # 4) K-accumulating fallback path (2x2x2 grid exercises init/accum/store).
    out_kt = jax.block_until_ready(
        euclidean_nn_forward(Q_big, None, block=128, block_k=128,
                             force_path="ktiled"))
    assert out_kt.shape == (D_big, D_big)
    assert jnp.allclose(out_kt, ref_big, atol=2e-3, rtol=2e-3)

    print("KERNEL_OK")
</pallas_src>

<mosaic_0001>
module attributes {stable_mosaic.version = 11 : i64} {
  func.func @_qtq_small_kernel(%arg0: memref<32x32xf32, #tpu.memory_space<vmem>>, %arg1: memref<32x32xf32, #tpu.memory_space<vmem>>) attributes {dimension_semantics = [], scalar_prefetch = 0 : i64, scratch_operands = 0 : i64, tpu.core_type = #tpu.core_type<tc>} {
    %c0 = arith.constant 0 : index
    %c0_0 = arith.constant 0 : index
    %0 = vector.load %arg0[%c0, %c0_0] : memref<32x32xf32, #tpu.memory_space<vmem>>, vector<32x32xf32>
    %cst = arith.constant dense<0.000000e+00> : vector<32x32xf32>
    %1 = tpu.matmul %0, %0, %cst {dimension_numbers = #tpu.dot_dimension_numbers<[0], [0], [1], [1], [0, 1, 1, 1], [], []>} : vector<32x32xf32>, vector<32x32xf32>, vector<32x32xf32> -> vector<32x32xf32>
    %c0_1 = arith.constant 0 : index
    %c0_2 = arith.constant 0 : index
    %2 = vector.load %arg1[%c0_1, %c0_2] : memref<32x32xf32, #tpu.memory_space<vmem>>, vector<32x32xf32>
    tpu.vector_store %arg1[%c0_1, %c0_2], %1 {strides = array<i32>} : memref<32x32xf32, #tpu.memory_space<vmem>>, vector<32x32xf32>,
    return
  }
}

</mosaic_0001>

<bundles_post_ra>
// kernel: tpu_custom_call.1
= control target key start
LH: loop header
LB: loop body
LE: loop exit
PB: predicated region body
PF: predicated region fallthrough
CT: control target
= control target key end

     0   :  { %6 = vsyncpa [#allocation3], 0  ;;  %s295_s0 = inlined_call_operand.hbm [shape: f32[32,32], index: 0, kind: input, shape index: {}]   ;;  %s296_s1 = inlined_call_operand.hbm [shape: f32[32,32], index: 1, kind: output, shape index: {}]  }
   0x1   :  { %7 = vsyncpa [#allocation4], 0  ;;  %s261_s6 = smov [#allocation2]  }
   0x2   :  { %s13_s7 = sshll.u32 %s261_s6, 4  ;;  %s14_s7 = int_to_ptr.vmem [resolvable:$true] %s13_s7 }
   0x3   :  { %s225_s8 = scalar_lea.vmem %s14_s7, 512  ;;  %p230_p1 = scmp.lt.s32.totalorder %s14_s7, %s14_s7 }
   0x4   :  { %p226_p0 = scmp.ne.s32.totalorder %s14_s7, %s225_s8  ;;  %p231_p2 = scmp.lt.s32.totalorder %s225_s8, %s225_s8 }
   0x6   :  { %p232_p3 = por %p231_p2, %p230_p1 }
   0x8   :  { %p233_p4 = pnand %p232_p3, %p226_p0 }
   0xa   :  { %236 = shalt.err (!%p233_p4)
}
   0xb   :  { %s262_s9 = smov 128   ;;  %s263_s10 = smov 8  }
   0xc   :  { %19 = dma.hbm_to_vmem [thread:$0]  %s295_s0, 512, %s14_s7, [#allocation3], %s262_s9, %s262_s9, %s263_s10  }
   0xd   :  { %257 = dma.done.wait [#allocation3], 512  }
   0xe   :  { %258 = vsyncadd [#allocation3], 4294966784  ;;  %v23_v0 = vld [vmem:[#allocation2] sm:$0xff]  ;;  %v26_v1 = vld [vmem:[#allocation2 + $0x18] sm:$0xff]  ;;  %vm59_vm0 = vcmask 261120   ;;  %s264_s0 = smov [#allocation5]  }
   0xf   :  { %27 = vxpose.xlu0.b32.start [1/4] (short) (narrow) %v23_v0, 32  ;;  %v24_v2 = vld [vmem:[#allocation2 + $0x8] sm:$0xff]  ;;  %190 = vmatprep.subr.mxu0 %v26_v1  ;;  %v25_v3 = vld [vmem:[#allocation2 + $0x10] sm:$0xff]  ;;  %s166_s13 = sshll.u32 %s264_s0, 4  ;;  %s167_s13 = int_to_ptr.vmem [resolvable:$true] %s166_s13 }
  0x10   :  { %204 = vmatprep.subr.mxu1 %v26_v1  ;;  %191 = vmatpush3.msra.mxu0 %v26_v1  ;;  %s237_s14 = scalar_lea.vmem %s167_s13, 512  ;;  %p242_p6 = scmp.lt.s32.totalorder %s167_s13, %s167_s13 }
  0x11   :  { %208 = vmatpush3.msra.mxu1 %v26_v1  ;;  %192 = vmatprep.subr.mxu0 %v25_v3  ;;  %p238_p5 = scmp.ne.s32.totalorder %s167_s13, %s237_s14  ;;  %p243_p7 = scmp.lt.s32.totalorder %s237_s14, %s237_s14 }
  0x12   :  { %205 = vmatprep.subr.mxu1 %v25_v3  ;;  %193 = vmatpush3.msra.mxu0 %v25_v3 }
  0x13   :  { %28 = vxpose.xlu0.b32.cont [2/4] (short) (narrow) %v24_v2, 32  ;;  %194 = vmatprep.subr.mxu0 %v24_v2  ;;  %p244_p8 = por %p243_p7, %p242_p6 }
  0x14   :  { %209 = vmatpush3.msra.mxu1 %v25_v3  ;;  %195 = vmatpush3.msra.mxu0 %v24_v2 }
  0x15   :  { %206 = vmatprep.subr.mxu1 %v24_v2  ;;  %196 = vmatprep.subr.mxu0 %v23_v0  ;;  %p245_p9 = pnand %p244_p8, %p238_p5 }
  0x16   :  { %210 = vmatpush3.msra.mxu1 %v24_v2  ;;  %197 = vmatpush3.msra.mxu0 %v23_v0 }
  0x17   :  { %29 = vxpose.xlu0.b32.cont [3/4] (short) (narrow) %v25_v3, 32  ;;  %207 = vmatprep.subr.mxu1 %v23_v0 }
  0x18   :  { %211 = vmatpush3.msra.mxu1 %v23_v0 }
  0x1b   :  { %30 = vxpose.xlu0.b32.end [4/4] (short) (narrow) %v26_v1, 32 }
  0x8b   :  { %v43_v4 = vpop.trf.xlu0 }
  0x8c   :  { %198 = vmatprep.mubr.msk.f32.mxu0 %vm59_vm0, %v43_v4 }
  0x8f   :  { %v44_v5 = vpop.trf.xlu0 }
  0x90   :  { %199 = vmatmul.mubr.msk.f32.vlgmr.msra.gmra.mxu0 %vm59_vm0, %v44_v5 }
  0x93   :  { %v45_v6 = vpop.trf.xlu0 }
  0x94   :  { %201 = vmatprep.mubr.msk.f32.mxu1 %vm59_vm0, %v45_v6 }
  0x97   :  { %v46_v7 = vpop.trf.xlu0 }
  0x98   :  { %202 = vmatmul.mubr.msk.f32.vlgmr.msra.gmra.mxu1 %vm59_vm0, %v46_v7 }
 0x150   :  { %v200_v8 = vpop.f32.mrf.mxu0 }
 0x151   :  { %158 = vst.msk [vmem:[#allocation5 + $0x8] sm:$0xff] %vm59_vm0, %v200_v8 }
 0x152   :  { %v138_v9 = vpop.f32.mrf.mxu0 }
 0x153   :  { %157 = vst.msk [vmem:[#allocation5] sm:$0xff] %vm59_vm0, %v138_v9 }
 0x158   :  { %v203_v10 = vpop.f32.mrf.mxu1 }
 0x159   :  { %160 = vst.msk [vmem:[#allocation5 + $0x18] sm:$0xff] %vm59_vm0, %v203_v10 }
 0x15a   :  { %v148_v11 = vpop.f32.mrf.mxu1 }
 0x15b   :  { %159 = vst.msk [vmem:[#allocation5 + $0x10] sm:$0xff] %vm59_vm0, %v148_v11 }
 0x15c   :  { %248 = shalt.err (!%p245_p9)
}
 0x15d   :  { %172 = dma.vmem_to_hbm [thread:$0]  %s167_s13, 512, %s296_s1, [#allocation4], %s262_s9, %s262_s9, %s263_s10  }
 0x15e   :  { %259 = dma.done.wait [#allocation4], 512  }
 0x15f   :  { %260 = vsyncadd [#allocation4], 4294966784 }
 0x160   :  { %176 = vsyncpa [#allocation3], 1 }
 0x161   :  { %177 = vsyncpa [#allocation4], 1 }

</bundles_post_ra>
